<compile_context>
chip_gen: v5e
topology: v5e:2x2
jax: 0.10.0
libtpu: 0.0.40
codegen_flags: <defaults>
</compile_context>

<pallas_src>
import numpy as np
import jax
import jax.numpy as jnp
from jax.experimental import pallas as pl
from jax.experimental.pallas import tpu as pltpu

INPUT_SIZE = 3
OUTPUT_SIZE = 4
HIDDEN_SIZE = 32
NUM_LAYERS = 2
SEQ_LEN = 8

LANE = 128


def _round_up(n, m):
    return ((n + m - 1) // m) * m


IN_PAD = _round_up(INPUT_SIZE, LANE)      # 128
H_PAD = _round_up(HIDDEN_SIZE, LANE)      # 128
OUT_PAD = _round_up(OUTPUT_SIZE, LANE)    # 128


# ---------------------------------------------------------------- kernel ----
def make_fused_kernel(num_layers, seq_len):
    """Single fused kernel: all RNN layers + the output Linear, wavefront-
    scheduled across (layer, time).

    Argument layout (all full-array VMEM refs, no grid):
      x_ref: (T, IN_PAD)                          bf16
      per layer l: wih_ref (prev_PAD, H_PAD) bf16, whh_ref (H_PAD, H_PAD) bf16,
                   b_ref (1, H_PAD) f32,          h0_ref (1, H_PAD) bf16
      wlin_ref: (H_PAD, OUT_PAD) bf16, blin_ref: (1, OUT_PAD) f32
      out_ref: (T, OUT_PAD) f32
    """

    def kernel(*args):
        x_ref = args[0]
        idx = 1
        layer_refs = []
        for _ in range(num_layers):
            layer_refs.append(args[idx:idx + 4])
            idx += 4
        wlin_ref = args[idx]
        blin_ref = args[idx + 1]
        out_ref = args[idx + 2]

        # Hoist all weight/bias/h0 reads out of the recurrence (loop invariant).
        wih = [r[0][...] for r in layer_refs]
        whh = [r[1][...] for r in layer_refs]
        bias = [r[2][...] for r in layer_refs]          # f32
        h = [r[3][...] for r in layer_refs]             # bf16 (1, H_PAD)
        wlin = wlin_ref[...]
        blin = blin_ref[...]

        # Layer-0 input contribution for ALL timesteps in one matmul,
        # hoisted out of the recurrence.  (T, IN_PAD) @ (IN_PAD, H_PAD), f32 acc.
        pre0 = jnp.dot(x_ref[...], wih[0],
                       preferred_element_type=jnp.float32) + bias[0]   # (T, H_PAD)

        # ---- Wavefront: diagonal d computes layer l's step t = d - l. ----
        # All updates within one diagonal read the previous diagonal's state,
        # so they are mutually independent and overlap on the MXU/EUP.
        for d in range(seq_len + num_layers - 1):
            new_h = list(h)
            for l in range(num_layers):
                t = d - l
                if not (0 <= t < seq_len):
                    continue
                if l == 0:
                    z = pre0[t:t + 1, :] + jnp.dot(
                        h[0], whh[0], preferred_element_type=jnp.float32)
                else:
                    # Two independent 128-deep dots (kept split for v5e's
                    # 128x128 MXU; overlap on v6e/v7x as well).
                    z = (bias[l]
                         + jnp.dot(h[l - 1], wih[l],
                                   preferred_element_type=jnp.float32)
                         + jnp.dot(h[l], whh[l],
                                   preferred_element_type=jnp.float32))
                hl = jnp.tanh(z)                                   # f32 (1, H_PAD)
                new_h[l] = hl.astype(jnp.bfloat16)
                if l == num_layers - 1:
                    # Fused per-step output projection (overlaps recurrence).
                    out_t = jnp.dot(new_h[l], wlin,
                                    preferred_element_type=jnp.float32) + blin
                    out_ref[pl.ds(t, 1), :] = out_t
            h = new_h

    return kernel


def _vmem_spec():
    return pl.BlockSpec(memory_space=pltpu.MemorySpace.VMEM)


# --------------------------------------------------------------- padding ----
def _pad2d(a, rows, cols):
    out = jnp.zeros((rows, cols), a.dtype)
    return out.at[:a.shape[0], :a.shape[1]].set(a)


def pad_params(params):
    """Zero-pad torch-shaped params to lane-dense kernel shapes (exact padding:
    padded lanes stay 0 through tanh) and cast weights / h0 to bf16."""
    padded_layers = []
    for l, (wih, whh, b, h0) in enumerate(params["layers"]):
        in_pad = IN_PAD if l == 0 else H_PAD
        padded_layers.append((
            _pad2d(wih, in_pad, H_PAD).astype(jnp.bfloat16),
            _pad2d(whh, H_PAD, H_PAD).astype(jnp.bfloat16),
            _pad2d(b, 1, H_PAD),                               # f32 (added to f32 acc)
            _pad2d(h0, 1, H_PAD).astype(jnp.bfloat16),
        ))
    w_lin, b_lin = params["linear"]
    padded_linear = (_pad2d(w_lin, H_PAD, OUT_PAD).astype(jnp.bfloat16),
                     _pad2d(b_lin, 1, OUT_PAD))                # f32
    return {"layers": padded_layers, "linear": padded_linear}


# ---------------------------------------------------------------- wrapper ---
def rnn_forward(x, padded_params):
    T = x.shape[0]
    num_layers = len(padded_params["layers"])

    x_pad = _pad2d(x, T, IN_PAD).astype(jnp.bfloat16)

    inputs = [x_pad]
    for layer in padded_params["layers"]:
        inputs.extend(layer)
    inputs.extend(padded_params["linear"])

    out_pad = pl.pallas_call(
        make_fused_kernel(num_layers, T),
        out_shape=jax.ShapeDtypeStruct((T, OUT_PAD), jnp.float32),
        in_specs=[_vmem_spec() for _ in inputs],
        out_specs=_vmem_spec(),
    )(*inputs)
    return out_pad[:, :OUTPUT_SIZE]


rnn_forward_jit = jax.jit(rnn_forward)


# -------------------------------------------------------------- reference ---
def ref_forward(x, params):
    """Pure-JAX f32 reference matching torch.nn.RNN(tanh) + nn.Linear."""
    h_seq = x
    for (wih, whh, b, h0) in params["layers"]:
        h = h0[0]
        hs = []
        for t in range(x.shape[0]):
            h = jnp.tanh(h_seq[t] @ wih + h @ whh + b[0])
            hs.append(h)
        h_seq = jnp.stack(hs)
    w_lin, b_lin = params["linear"]
    return h_seq @ w_lin + b_lin


# ------------------------------------------------------------------ setup ---
def init_params(key):
    """Deterministic synthetic parameters matching torch.nn.RNN / nn.Linear
    shapes (stored pre-transposed vs. torch for the kernels)."""
    bound_rnn = 1.0 / np.sqrt(HIDDEN_SIZE)
    layers = []
    for l in range(NUM_LAYERS):
        in_dim = INPUT_SIZE if l == 0 else HIDDEN_SIZE
        key, k1, k2, k3, k4, k5 = jax.random.split(key, 6)
        # torch weight_ih_l{l}: (H, in_dim) -> stored as (in_dim, H)
        wih = jax.random.uniform(k1, (in_dim, HIDDEN_SIZE), jnp.float32,
                                 -bound_rnn, bound_rnn)
        # torch weight_hh_l{l}: (H, H) -> stored transposed
        whh = jax.random.uniform(k2, (HIDDEN_SIZE, HIDDEN_SIZE), jnp.float32,
                                 -bound_rnn, bound_rnn)
        b_ih = jax.random.uniform(k3, (HIDDEN_SIZE,), jnp.float32,
                                  -bound_rnn, bound_rnn)
        b_hh = jax.random.uniform(k4, (HIDDEN_SIZE,), jnp.float32,
                                  -bound_rnn, bound_rnn)
        b = (b_ih + b_hh).reshape(1, HIDDEN_SIZE)
        # self.h0: torch.randn(num_layers, hidden_size)
        h0 = jax.random.normal(k5, (1, HIDDEN_SIZE), jnp.float32)
        layers.append((wih, whh, b, h0))

    key, k6, k7 = jax.random.split(key, 3)
    bound_lin = 1.0 / np.sqrt(HIDDEN_SIZE)
    # torch linear.weight: (4, H) -> stored as (H, 4); bias: (4,) -> (1, 4)
    w_lin = jax.random.uniform(k6, (HIDDEN_SIZE, OUTPUT_SIZE), jnp.float32,
                               -bound_lin, bound_lin)
    b_lin = jax.random.uniform(k7, (1, OUTPUT_SIZE), jnp.float32,
                               -bound_lin, bound_lin)
    return {"layers": layers, "linear": (w_lin, b_lin)}


if __name__ == "__main__":
    root = jax.random.PRNGKey(0)
    k_param, k_x = jax.random.split(root)
    params = init_params(k_param)
    padded = pad_params(params)
    x = jax.random.normal(k_x, (SEQ_LEN, INPUT_SIZE), jnp.float32)

    out = jax.block_until_ready(rnn_forward_jit(x, padded))
    ref = jax.block_until_ready(ref_forward(x, params))

    assert out.shape == (SEQ_LEN, OUTPUT_SIZE)
    # bf16 weights/activations with f32 accumulation vs. the pure-f32
    # reference: expected deviation is a few 1e-3; 2e-2 gives safe margin.
    np.testing.assert_allclose(np.asarray(out), np.asarray(ref),
                               rtol=2e-2, atol=2e-2)
    print("KERNEL_OK")
</pallas_src>

<mosaic_0001>
module attributes {stable_mosaic.version = 11 : i64} {
  func.func @kernel(%arg0: memref<8x128xbf16, #tpu.memory_space<vmem>>, %arg1: memref<128x128xbf16, #tpu.memory_space<vmem>>, %arg2: memref<128x128xbf16, #tpu.memory_space<vmem>>, %arg3: memref<1x128xf32, #tpu.memory_space<vmem>>, %arg4: memref<1x128xbf16, #tpu.memory_space<vmem>>, %arg5: memref<128x128xbf16, #tpu.memory_space<vmem>>, %arg6: memref<128x128xbf16, #tpu.memory_space<vmem>>, %arg7: memref<1x128xf32, #tpu.memory_space<vmem>>, %arg8: memref<1x128xbf16, #tpu.memory_space<vmem>>, %arg9: memref<128x128xbf16, #tpu.memory_space<vmem>>, %arg10: memref<1x128xf32, #tpu.memory_space<vmem>>, %arg11: memref<8x128xf32, #tpu.memory_space<vmem>>) attributes {dimension_semantics = [], scalar_prefetch = 0 : i64, scratch_operands = 0 : i64, tpu.core_type = #tpu.core_type<tc>} {
    %c0 = arith.constant 0 : index
    %c0_0 = arith.constant 0 : index
    %0 = vector.load %arg1[%c0, %c0_0] : memref<128x128xbf16, #tpu.memory_space<vmem>>, vector<128x128xbf16>
    %c0_1 = arith.constant 0 : index
    %c0_2 = arith.constant 0 : index
    %1 = vector.load %arg5[%c0_1, %c0_2] : memref<128x128xbf16, #tpu.memory_space<vmem>>, vector<128x128xbf16>
    %c0_3 = arith.constant 0 : index
    %c0_4 = arith.constant 0 : index
    %2 = vector.load %arg2[%c0_3, %c0_4] : memref<128x128xbf16, #tpu.memory_space<vmem>>, vector<128x128xbf16>
    %c0_5 = arith.constant 0 : index
    %c0_6 = arith.constant 0 : index
    %3 = vector.load %arg6[%c0_5, %c0_6] : memref<128x128xbf16, #tpu.memory_space<vmem>>, vector<128x128xbf16>
    %c0_7 = arith.constant 0 : index
    %c0_8 = arith.constant 0 : index
    %4 = vector.load %arg3[%c0_7, %c0_8] : memref<1x128xf32, #tpu.memory_space<vmem>>, vector<1x128xf32>
    %c0_9 = arith.constant 0 : index
    %c0_10 = arith.constant 0 : index
    %5 = vector.load %arg7[%c0_9, %c0_10] : memref<1x128xf32, #tpu.memory_space<vmem>>, vector<1x128xf32>
    %c0_11 = arith.constant 0 : index
    %c0_12 = arith.constant 0 : index
    %6 = vector.load %arg4[%c0_11, %c0_12] : memref<1x128xbf16, #tpu.memory_space<vmem>>, vector<1x128xbf16>
    %c0_13 = arith.constant 0 : index
    %c0_14 = arith.constant 0 : index
    %7 = vector.load %arg8[%c0_13, %c0_14] : memref<1x128xbf16, #tpu.memory_space<vmem>>, vector<1x128xbf16>
    %c0_15 = arith.constant 0 : index
    %c0_16 = arith.constant 0 : index
    %8 = vector.load %arg9[%c0_15, %c0_16] : memref<128x128xbf16, #tpu.memory_space<vmem>>, vector<128x128xbf16>
    %c0_17 = arith.constant 0 : index
    %c0_18 = arith.constant 0 : index
    %9 = vector.load %arg10[%c0_17, %c0_18] : memref<1x128xf32, #tpu.memory_space<vmem>>, vector<1x128xf32>
    %c0_19 = arith.constant 0 : index
    %c0_20 = arith.constant 0 : index
    %10 = vector.load %arg0[%c0_19, %c0_20] : memref<8x128xbf16, #tpu.memory_space<vmem>>, vector<8x128xbf16>
    %cst = arith.constant dense<0.000000e+00> : vector<8x128xf32>
    %11 = tpu.matmul %10, %0, %cst {dimension_numbers = #tpu.dot_dimension_numbers<[1], [0], [0], [1], [0, 0, 1, 1], [], []>} : vector<8x128xbf16>, vector<128x128xbf16>, vector<8x128xf32> -> vector<8x128xf32>
    %12 = vector.broadcast %4 : vector<1x128xf32> to vector<8x128xf32>
    %13 = arith.addf %11, %12 : vector<8x128xf32>
    %14 = vector.extract_strided_slice %13 {offsets = [0, 0], sizes = [1, 128], strides = [1, 1]} : vector<8x128xf32> to vector<1x128xf32>
    %cst_21 = arith.constant dense<0.000000e+00> : vector<1x128xf32>
    %15 = tpu.matmul %6, %2, %cst_21 {dimension_numbers = #tpu.dot_dimension_numbers<[1], [0], [0], [1], [0, 0, 1, 1], [], []>} : vector<1x128xbf16>, vector<128x128xbf16>, vector<1x128xf32> -> vector<1x128xf32>
    %16 = arith.addf %14, %15 : vector<1x128xf32>
    %17 = math.tanh %16 : vector<1x128xf32>
    %18 = arith.truncf %17 : vector<1x128xf32> to vector<1x128xbf16>
    %19 = vector.extract_strided_slice %13 {offsets = [1, 0], sizes = [1, 128], strides = [1, 1]} : vector<8x128xf32> to vector<1x128xf32>
    %cst_22 = arith.constant dense<0.000000e+00> : vector<1x128xf32>
    %20 = tpu.matmul %18, %2, %cst_22 {dimension_numbers = #tpu.dot_dimension_numbers<[1], [0], [0], [1], [0, 0, 1, 1], [], []>} : vector<1x128xbf16>, vector<128x128xbf16>, vector<1x128xf32> -> vector<1x128xf32>
    %21 = arith.addf %19, %20 : vector<1x128xf32>
    %22 = math.tanh %21 : vector<1x128xf32>
    %23 = arith.truncf %22 : vector<1x128xf32> to vector<1x128xbf16>
    %cst_23 = arith.constant dense<0.000000e+00> : vector<1x128xf32>
    %24 = tpu.matmul %18, %1, %cst_23 {dimension_numbers = #tpu.dot_dimension_numbers<[1], [0], [0], [1], [0, 0, 1, 1], [], []>} : vector<1x128xbf16>, vector<128x128xbf16>, vector<1x128xf32> -> vector<1x128xf32>
    %25 = arith.addf %5, %24 : vector<1x128xf32>
    %cst_24 = arith.constant dense<0.000000e+00> : vector<1x128xf32>
    %26 = tpu.matmul %7, %3, %cst_24 {dimension_numbers = #tpu.dot_dimension_numbers<[1], [0], [0], [1], [0, 0, 1, 1], [], []>} : vector<1x128xbf16>, vector<128x128xbf16>, vector<1x128xf32> -> vector<1x128xf32>
    %27 = arith.addf %25, %26 : vector<1x128xf32>
    %28 = math.tanh %27 : vector<1x128xf32>
    %29 = arith.truncf %28 : vector<1x128xf32> to vector<1x128xbf16>
    %cst_25 = arith.constant dense<0.000000e+00> : vector<1x128xf32>
    %30 = tpu.matmul %29, %8, %cst_25 {dimension_numbers = #tpu.dot_dimension_numbers<[1], [0], [0], [1], [0, 0, 1, 1], [], []>} : vector<1x128xbf16>, vector<128x128xbf16>, vector<1x128xf32> -> vector<1x128xf32>
    %31 = arith.addf %30, %9 : vector<1x128xf32>
    %c0_26 = arith.constant 0 : index
    %c0_27 = arith.constant 0 : index
    %32 = vector.load %arg11[%c0_26, %c0_27] : memref<8x128xf32, #tpu.memory_space<vmem>>, vector<1x128xf32>
    tpu.vector_store %arg11[%c0_26, %c0_27], %31 {strides = array<i32>} : memref<8x128xf32, #tpu.memory_space<vmem>>, vector<1x128xf32>,
    %33 = vector.extract_strided_slice %13 {offsets = [2, 0], sizes = [1, 128], strides = [1, 1]} : vector<8x128xf32> to vector<1x128xf32>
    %cst_28 = arith.constant dense<0.000000e+00> : vector<1x128xf32>
    %34 = tpu.matmul %23, %2, %cst_28 {dimension_numbers = #tpu.dot_dimension_numbers<[1], [0], [0], [1], [0, 0, 1, 1], [], []>} : vector<1x128xbf16>, vector<128x128xbf16>, vector<1x128xf32> -> vector<1x128xf32>
    %35 = arith.addf %33, %34 : vector<1x128xf32>
    %36 = math.tanh %35 : vector<1x128xf32>
    %37 = arith.truncf %36 : vector<1x128xf32> to vector<1x128xbf16>
    %cst_29 = arith.constant dense<0.000000e+00> : vector<1x128xf32>
    %38 = tpu.matmul %23, %1, %cst_29 {dimension_numbers = #tpu.dot_dimension_numbers<[1], [0], [0], [1], [0, 0, 1, 1], [], []>} : vector<1x128xbf16>, vector<128x128xbf16>, vector<1x128xf32> -> vector<1x128xf32>
    %39 = arith.addf %5, %38 : vector<1x128xf32>
    %cst_30 = arith.constant dense<0.000000e+00> : vector<1x128xf32>
    %40 = tpu.matmul %29, %3, %cst_30 {dimension_numbers = #tpu.dot_dimension_numbers<[1], [0], [0], [1], [0, 0, 1, 1], [], []>} : vector<1x128xbf16>, vector<128x128xbf16>, vector<1x128xf32> -> vector<1x128xf32>
    %41 = arith.addf %39, %40 : vector<1x128xf32>
    %42 = math.tanh %41 : vector<1x128xf32>
    %43 = arith.truncf %42 : vector<1x128xf32> to vector<1x128xbf16>
    %cst_31 = arith.constant dense<0.000000e+00> : vector<1x128xf32>
    %44 = tpu.matmul %43, %8, %cst_31 {dimension_numbers = #tpu.dot_dimension_numbers<[1], [0], [0], [1], [0, 0, 1, 1], [], []>} : vector<1x128xbf16>, vector<128x128xbf16>, vector<1x128xf32> -> vector<1x128xf32>
    %45 = arith.addf %44, %9 : vector<1x128xf32>
    %c1 = arith.constant 1 : index
    %c0_32 = arith.constant 0 : index
    %46 = vector.load %arg11[%c1, %c0_32] : memref<8x128xf32, #tpu.memory_space<vmem>>, vector<1x128xf32>
    tpu.vector_store %arg11[%c1, %c0_32], %45 {strides = array<i32>} : memref<8x128xf32, #tpu.memory_space<vmem>>, vector<1x128xf32>,
    %47 = vector.extract_strided_slice %13 {offsets = [3, 0], sizes = [1, 128], strides = [1, 1]} : vector<8x128xf32> to vector<1x128xf32>
    %cst_33 = arith.constant dense<0.000000e+00> : vector<1x128xf32>
    %48 = tpu.matmul %37, %2, %cst_33 {dimension_numbers = #tpu.dot_dimension_numbers<[1], [0], [0], [1], [0, 0, 1, 1], [], []>} : vector<1x128xbf16>, vector<128x128xbf16>, vector<1x128xf32> -> vector<1x128xf32>
    %49 = arith.addf %47, %48 : vector<1x128xf32>
    %50 = math.tanh %49 : vector<1x128xf32>
    %51 = arith.truncf %50 : vector<1x128xf32> to vector<1x128xbf16>
    %cst_34 = arith.constant dense<0.000000e+00> : vector<1x128xf32>
    %52 = tpu.matmul %37, %1, %cst_34 {dimension_numbers = #tpu.dot_dimension_numbers<[1], [0], [0], [1], [0, 0, 1, 1], [], []>} : vector<1x128xbf16>, vector<128x128xbf16>, vector<1x128xf32> -> vector<1x128xf32>
    %53 = arith.addf %5, %52 : vector<1x128xf32>
    %cst_35 = arith.constant dense<0.000000e+00> : vector<1x128xf32>
    %54 = tpu.matmul %43, %3, %cst_35 {dimension_numbers = #tpu.dot_dimension_numbers<[1], [0], [0], [1], [0, 0, 1, 1], [], []>} : vector<1x128xbf16>, vector<128x128xbf16>, vector<1x128xf32> -> vector<1x128xf32>
    %55 = arith.addf %53, %54 : vector<1x128xf32>
    %56 = math.tanh %55 : vector<1x128xf32>
    %57 = arith.truncf %56 : vector<1x128xf32> to vector<1x128xbf16>
    %cst_36 = arith.constant dense<0.000000e+00> : vector<1x128xf32>
    %58 = tpu.matmul %57, %8, %cst_36 {dimension_numbers = #tpu.dot_dimension_numbers<[1], [0], [0], [1], [0, 0, 1, 1], [], []>} : vector<1x128xbf16>, vector<128x128xbf16>, vector<1x128xf32> -> vector<1x128xf32>
    %59 = arith.addf %58, %9 : vector<1x128xf32>
    %c2 = arith.constant 2 : index
    %c0_37 = arith.constant 0 : index
    %60 = vector.load %arg11[%c2, %c0_37] : memref<8x128xf32, #tpu.memory_space<vmem>>, vector<1x128xf32>
    tpu.vector_store %arg11[%c2, %c0_37], %59 {strides = array<i32>} : memref<8x128xf32, #tpu.memory_space<vmem>>, vector<1x128xf32>,
    %61 = vector.extract_strided_slice %13 {offsets = [4, 0], sizes = [1, 128], strides = [1, 1]} : vector<8x128xf32> to vector<1x128xf32>
    %cst_38 = arith.constant dense<0.000000e+00> : vector<1x128xf32>
    %62 = tpu.matmul %51, %2, %cst_38 {dimension_numbers = #tpu.dot_dimension_numbers<[1], [0], [0], [1], [0, 0, 1, 1], [], []>} : vector<1x128xbf16>, vector<128x128xbf16>, vector<1x128xf32> -> vector<1x128xf32>
    %63 = arith.addf %61, %62 : vector<1x128xf32>
    %64 = math.tanh %63 : vector<1x128xf32>
    %65 = arith.truncf %64 : vector<1x128xf32> to vector<1x128xbf16>
    %cst_39 = arith.constant dense<0.000000e+00> : vector<1x128xf32>
    %66 = tpu.matmul %51, %1, %cst_39 {dimension_numbers = #tpu.dot_dimension_numbers<[1], [0], [0], [1], [0, 0, 1, 1], [], []>} : vector<1x128xbf16>, vector<128x128xbf16>, vector<1x128xf32> -> vector<1x128xf32>
    %67 = arith.addf %5, %66 : vector<1x128xf32>
    %cst_40 = arith.constant dense<0.000000e+00> : vector<1x128xf32>
    %68 = tpu.matmul %57, %3, %cst_40 {dimension_numbers = #tpu.dot_dimension_numbers<[1], [0], [0], [1], [0, 0, 1, 1], [], []>} : vector<1x128xbf16>, vector<128x128xbf16>, vector<1x128xf32> -> vector<1x128xf32>
    %69 = arith.addf %67, %68 : vector<1x128xf32>
    %70 = math.tanh %69 : vector<1x128xf32>
    %71 = arith.truncf %70 : vector<1x128xf32> to vector<1x128xbf16>
    %cst_41 = arith.constant dense<0.000000e+00> : vector<1x128xf32>
    %72 = tpu.matmul %71, %8, %cst_41 {dimension_numbers = #tpu.dot_dimension_numbers<[1], [0], [0], [1], [0, 0, 1, 1], [], []>} : vector<1x128xbf16>, vector<128x128xbf16>, vector<1x128xf32> -> vector<1x128xf32>
    %73 = arith.addf %72, %9 : vector<1x128xf32>
    %c3 = arith.constant 3 : index
    %c0_42 = arith.constant 0 : index
    %74 = vector.load %arg11[%c3, %c0_42] : memref<8x128xf32, #tpu.memory_space<vmem>>, vector<1x128xf32>
    tpu.vector_store %arg11[%c3, %c0_42], %73 {strides = array<i32>} : memref<8x128xf32, #tpu.memory_space<vmem>>, vector<1x128xf32>,
    %75 = vector.extract_strided_slice %13 {offsets = [5, 0], sizes = [1, 128], strides = [1, 1]} : vector<8x128xf32> to vector<1x128xf32>
    %cst_43 = arith.constant dense<0.000000e+00> : vector<1x128xf32>
    %76 = tpu.matmul %65, %2, %cst_43 {dimension_numbers = #tpu.dot_dimension_numbers<[1], [0], [0], [1], [0, 0, 1, 1], [], []>} : vector<1x128xbf16>, vector<128x128xbf16>, vector<1x128xf32> -> vector<1x128xf32>
    %77 = arith.addf %75, %76 : vector<1x128xf32>
    %78 = math.tanh %77 : vector<1x128xf32>
    %79 = arith.truncf %78 : vector<1x128xf32> to vector<1x128xbf16>
    %cst_44 = arith.constant dense<0.000000e+00> : vector<1x128xf32>
    %80 = tpu.matmul %65, %1, %cst_44 {dimension_numbers = #tpu.dot_dimension_numbers<[1], [0], [0], [1], [0, 0, 1, 1], [], []>} : vector<1x128xbf16>, vector<128x128xbf16>, vector<1x128xf32> -> vector<1x128xf32>
    %81 = arith.addf %5, %80 : vector<1x128xf32>
    %cst_45 = arith.constant dense<0.000000e+00> : vector<1x128xf32>
    %82 = tpu.matmul %71, %3, %cst_45 {dimension_numbers = #tpu.dot_dimension_numbers<[1], [0], [0], [1], [0, 0, 1, 1], [], []>} : vector<1x128xbf16>, vector<128x128xbf16>, vector<1x128xf32> -> vector<1x128xf32>
    %83 = arith.addf %81, %82 : vector<1x128xf32>
    %84 = math.tanh %83 : vector<1x128xf32>
    %85 = arith.truncf %84 : vector<1x128xf32> to vector<1x128xbf16>
    %cst_46 = arith.constant dense<0.000000e+00> : vector<1x128xf32>
    %86 = tpu.matmul %85, %8, %cst_46 {dimension_numbers = #tpu.dot_dimension_numbers<[1], [0], [0], [1], [0, 0, 1, 1], [], []>} : vector<1x128xbf16>, vector<128x128xbf16>, vector<1x128xf32> -> vector<1x128xf32>
    %87 = arith.addf %86, %9 : vector<1x128xf32>
    %c4 = arith.constant 4 : index
    %c0_47 = arith.constant 0 : index
    %88 = vector.load %arg11[%c4, %c0_47] : memref<8x128xf32, #tpu.memory_space<vmem>>, vector<1x128xf32>
    tpu.vector_store %arg11[%c4, %c0_47], %87 {strides = array<i32>} : memref<8x128xf32, #tpu.memory_space<vmem>>, vector<1x128xf32>,
    %89 = vector.extract_strided_slice %13 {offsets = [6, 0], sizes = [1, 128], strides = [1, 1]} : vector<8x128xf32> to vector<1x128xf32>
    %cst_48 = arith.constant dense<0.000000e+00> : vector<1x128xf32>
    %90 = tpu.matmul %79, %2, %cst_48 {dimension_numbers = #tpu.dot_dimension_numbers<[1], [0], [0], [1], [0, 0, 1, 1], [], []>} : vector<1x128xbf16>, vector<128x128xbf16>, vector<1x128xf32> -> vector<1x128xf32>
    %91 = arith.addf %89, %90 : vector<1x128xf32>
    %92 = math.tanh %91 : vector<1x128xf32>
    %93 = arith.truncf %92 : vector<1x128xf32> to vector<1x128xbf16>
    %cst_49 = arith.constant dense<0.000000e+00> : vector<1x128xf32>
    %94 = tpu.matmul %79, %1, %cst_49 {dimension_numbers = #tpu.dot_dimension_numbers<[1], [0], [0], [1], [0, 0, 1, 1], [], []>} : vector<1x128xbf16>, vector<128x128xbf16>, vector<1x128xf32> -> vector<1x128xf32>
    %95 = arith.addf %5, %94 : vector<1x128xf32>
    %cst_50 = arith.constant dense<0.000000e+00> : vector<1x128xf32>
    %96 = tpu.matmul %85, %3, %cst_50 {dimension_numbers = #tpu.dot_dimension_numbers<[1], [0], [0], [1], [0, 0, 1, 1], [], []>} : vector<1x128xbf16>, vector<128x128xbf16>, vector<1x128xf32> -> vector<1x128xf32>
    %97 = arith.addf %95, %96 : vector<1x128xf32>
    %98 = math.tanh %97 : vector<1x128xf32>
    %99 = arith.truncf %98 : vector<1x128xf32> to vector<1x128xbf16>
    %cst_51 = arith.constant dense<0.000000e+00> : vector<1x128xf32>
    %100 = tpu.matmul %99, %8, %cst_51 {dimension_numbers = #tpu.dot_dimension_numbers<[1], [0], [0], [1], [0, 0, 1, 1], [], []>} : vector<1x128xbf16>, vector<128x128xbf16>, vector<1x128xf32> -> vector<1x128xf32>
    %101 = arith.addf %100, %9 : vector<1x128xf32>
    %c5 = arith.constant 5 : index
    %c0_52 = arith.constant 0 : index
    %102 = vector.load %arg11[%c5, %c0_52] : memref<8x128xf32, #tpu.memory_space<vmem>>, vector<1x128xf32>
    tpu.vector_store %arg11[%c5, %c0_52], %101 {strides = array<i32>} : memref<8x128xf32, #tpu.memory_space<vmem>>, vector<1x128xf32>,
    %103 = vector.extract_strided_slice %13 {offsets = [7, 0], sizes = [1, 128], strides = [1, 1]} : vector<8x128xf32> to vector<1x128xf32>
    %cst_53 = arith.constant dense<0.000000e+00> : vector<1x128xf32>
    %104 = tpu.matmul %93, %2, %cst_53 {dimension_numbers = #tpu.dot_dimension_numbers<[1], [0], [0], [1], [0, 0, 1, 1], [], []>} : vector<1x128xbf16>, vector<128x128xbf16>, vector<1x128xf32> -> vector<1x128xf32>
    %105 = arith.addf %103, %104 : vector<1x128xf32>
    %106 = math.tanh %105 : vector<1x128xf32>
    %107 = arith.truncf %106 : vector<1x128xf32> to vector<1x128xbf16>
    %cst_54 = arith.constant dense<0.000000e+00> : vector<1x128xf32>
    %108 = tpu.matmul %93, %1, %cst_54 {dimension_numbers = #tpu.dot_dimension_numbers<[1], [0], [0], [1], [0, 0, 1, 1], [], []>} : vector<1x128xbf16>, vector<128x128xbf16>, vector<1x128xf32> -> vector<1x128xf32>
    %109 = arith.addf %5, %108 : vector<1x128xf32>
    %cst_55 = arith.constant dense<0.000000e+00> : vector<1x128xf32>
    %110 = tpu.matmul %99, %3, %cst_55 {dimension_numbers = #tpu.dot_dimension_numbers<[1], [0], [0], [1], [0, 0, 1, 1], [], []>} : vector<1x128xbf16>, vector<128x128xbf16>, vector<1x128xf32> -> vector<1x128xf32>
    %111 = arith.addf %109, %110 : vector<1x128xf32>
    %112 = math.tanh %111 : vector<1x128xf32>
    %113 = arith.truncf %112 : vector<1x128xf32> to vector<1x128xbf16>
    %cst_56 = arith.constant dense<0.000000e+00> : vector<1x128xf32>
    %114 = tpu.matmul %113, %8, %cst_56 {dimension_numbers = #tpu.dot_dimension_numbers<[1], [0], [0], [1], [0, 0, 1, 1], [], []>} : vector<1x128xbf16>, vector<128x128xbf16>, vector<1x128xf32> -> vector<1x128xf32>
    %115 = arith.addf %114, %9 : vector<1x128xf32>
    %c6 = arith.constant 6 : index
    %c0_57 = arith.constant 0 : index
    %116 = vector.load %arg11[%c6, %c0_57] : memref<8x128xf32, #tpu.memory_space<vmem>>, vector<1x128xf32>
    tpu.vector_store %arg11[%c6, %c0_57], %115 {strides = array<i32>} : memref<8x128xf32, #tpu.memory_space<vmem>>, vector<1x128xf32>,
    %cst_58 = arith.constant dense<0.000000e+00> : vector<1x128xf32>
    %117 = tpu.matmul %107, %1, %cst_58 {dimension_numbers = #tpu.dot_dimension_numbers<[1], [0], [0], [1], [0, 0, 1, 1], [], []>} : vector<1x128xbf16>, vector<128x128xbf16>, vector<1x128xf32> -> vector<1x128xf32>
    %118 = arith.addf %5, %117 : vector<1x128xf32>
    %cst_59 = arith.constant dense<0.000000e+00> : vector<1x128xf32>
    %119 = tpu.matmul %113, %3, %cst_59 {dimension_numbers = #tpu.dot_dimension_numbers<[1], [0], [0], [1], [0, 0, 1, 1], [], []>} : vector<1x128xbf16>, vector<128x128xbf16>, vector<1x128xf32> -> vector<1x128xf32>
    %120 = arith.addf %118, %119 : vector<1x128xf32>
    %121 = math.tanh %120 : vector<1x128xf32>
    %122 = arith.truncf %121 : vector<1x128xf32> to vector<1x128xbf16>
    %cst_60 = arith.constant dense<0.000000e+00> : vector<1x128xf32>
    %123 = tpu.matmul %122, %8, %cst_60 {dimension_numbers = #tpu.dot_dimension_numbers<[1], [0], [0], [1], [0, 0, 1, 1], [], []>} : vector<1x128xbf16>, vector<128x128xbf16>, vector<1x128xf32> -> vector<1x128xf32>
    %124 = arith.addf %123, %9 : vector<1x128xf32>
    %c7 = arith.constant 7 : index
    %c0_61 = arith.constant 0 : index
    %125 = vector.load %arg11[%c7, %c0_61] : memref<8x128xf32, #tpu.memory_space<vmem>>, vector<1x128xf32>
    tpu.vector_store %arg11[%c7, %c0_61], %124 {strides = array<i32>} : memref<8x128xf32, #tpu.memory_space<vmem>>, vector<1x128xf32>,
    return
  }
}

</mosaic_0001>

<bundles_post_ra>
// kernel: rnn_forward.1
= control target key start
LH: loop header
LB: loop body
LE: loop exit
PB: predicated region body
PF: predicated region fallthrough
CT: control target
= control target key end

     0   :  { %16 = vsyncpa [#allocation3], 0  ;;  %s1834_s0 = inlined_call_operand.vmem [shape: bf16[8,128], index: 0, kind: input, shape index: {}]   ;;  %s1835_s1 = inlined_call_operand.hbm [shape: bf16[128,128], index: 1, kind: input, shape index: {}]   ;;  %s1836_s2 = inlined_call_operand.hbm [shape: bf16[128,128], index: 2, kind: input, shape index: {}]   ;;  %s1837_s3 = inlined_call_operand.vmem [shape: f32[1,128], index: 3, kind: input, shape index: {}]   ;;  %s1838_s4 = inlined_call_operand.vmem [shape: bf16[1,128], index: 4, kind: input, shape index: {}]   ;;  %s1839_s5 = inlined_call_operand.hbm [shape: bf16[128,128], index: 5, kind: input, shape index: {}]   ;;  %s1840_s6 = inlined_call_operand.hbm [shape: bf16[128,128], index: 6, kind: input, shape index: {}]   ;;  %s1841_s7 = inlined_call_operand.vmem [shape: f32[1,128], index: 7, kind: input, shape index: {}]   ;;  %s1842_s8 = inlined_call_operand.vmem [shape: bf16[1,128], index: 8, kind: input, shape index: {}]   ;;  %s1843_s9 = inlined_call_operand.hbm [shape: bf16[128,128], index: 9, kind: input, shape index: {}]   ;;  %s1844_s10 = inlined_call_operand.vmem [shape: f32[1,128], index: 10, kind: input, shape index: {}]   ;;  %s1845_s11 = inlined_call_operand.vmem [shape: f32[8,128], index: 11, kind: output, shape index: {}]  }
   0x1   :  { %17 = vsyncpa [#allocation5], 0 }
   0x2   :  { %18 = vsyncpa [#allocation8], 0  ;;  %s38_s19 = sshll.u32 %s1836_s2, 4  ;;  %s1360_s20 = smov [#allocation4]   ;;  %s39_s19 = int_to_ptr.hbm [resolvable:$true] %s38_s19 }
   0x3   :  { %s40_s21 = sshll.u32 %s1360_s20, 4  ;;  %s68_s24 = sshll.u32 %s1840_s6, 4  ;;  %s41_s21 = int_to_ptr.vmem [resolvable:$true] %s40_s21  ;;  %s69_s24 = int_to_ptr.hbm [resolvable:$true] %s68_s24 }
   0x4   :  { %s1361_s25 = smov 64   ;;  %s1362_s26 = smov 4  }
   0x5   :  { %46 = dma.hbm_to_vmem [thread:$0]  %s39_s19, 1024, %s41_s21, [#allocation5], %s1361_s25, %s1361_s25, %s1362_s26  }
   0x6   :  { %s1363_s27 = smov [#allocation7]   ;;  %s25_s12 = sshll.u32 %s1835_s1, 4  ;;  %s26_s12 = int_to_ptr.hbm [resolvable:$true] %s25_s12 }
   0x7   :  { %s70_s28 = sshll.u32 %s1363_s27, 4  ;;  %s55_s14 = sshll.u32 %s1839_s5, 4  ;;  %s71_s28 = int_to_ptr.vmem [resolvable:$true] %s70_s28  ;;  %s56_s14 = int_to_ptr.hbm [resolvable:$true] %s55_s14 }
   0x8   :  { %76 = dma.hbm_to_vmem [thread:$0]  %s69_s24, 1024, %s71_s28, [#allocation8], %s1361_s25, %s1361_s25, %s1362_s26  }
   0x9   :  { %s1364_s15 = smov [#allocation2]   ;;  %s1365_s6 = smov [#allocation6]  }
   0xa   :  { %s27_s16 = sshll.u32 %s1364_s15, 4  ;;  %s57_s17 = sshll.u32 %s1365_s6, 4  ;;  %s28_s16 = int_to_ptr.vmem [resolvable:$true] %s27_s16  ;;  %s58_s17 = int_to_ptr.vmem [resolvable:$true] %s57_s17 }
   0xb   :  { %33 = dma.hbm_to_vmem [thread:$0]  %s26_s12, 1024, %s28_s16, [#allocation3], %s1361_s25, %s1361_s25, %s1362_s26  }
   0xc   :  { %s85_s20 = sshll.u32 %s1843_s9, 4  ;;  %s1366_s1 = smov [#allocation9]   ;;  %s86_s20 = int_to_ptr.hbm [resolvable:$true] %s85_s20 }
   0xd   :  { %63 = dma.hbm_to_vmem [thread:$0]  %s56_s14, 1024, %s58_s17, [#allocation5], %s1361_s25, %s1361_s25, %s1362_s26  }
   0xe   :  { %s87_s21 = sshll.u32 %s1366_s1, 4  ;;  %s88_s21 = int_to_ptr.vmem [resolvable:$true] %s87_s21 }
   0xf   :  { %93 = dma.hbm_to_vmem [thread:$0]  %s86_s20, 1024, %s88_s21, [#allocation8], %s1361_s25, %s1361_s25, %s1362_s26  }
  0x10   :  { %1354 = dma.done.wait [#allocation3], 1024  }
  0x11   :  { %1355 = vsyncadd [#allocation3], 4294966272 }
  0x12   :  { %1356 = dma.done.wait [#allocation5], 2048  }
  0x13   :  { %1357 = vsyncadd [#allocation5], 4294965248 }
  0x14   :  { %1358 = dma.done.wait [#allocation8], 2048  }
  0x15   :  { %1359 = vsyncadd [#allocation8], 4294965248  ;;  %v1161_v0 = vld [vmem:[#allocation2 + $0x38] sm:$0xff]  ;;  %v1160_v2 = vld [vmem:[#allocation2 + $0x30] sm:$0xff] }
  0x16   :  { %v1442_v1 = vld [vmem:[#allocation4 + $0x38] sm:$0xff]  ;;  %253 = vmatpush.bf16.msra.mxu0 %v1161_v0  ;;  %v1445_v3 = vld [vmem:[#allocation4 + $0x30] sm:$0xff]  ;;  %v1159_v4 = vld [vmem:[#allocation2 + $0x28] sm:$0xff] }
  0x17   :  { %314 = vmatpush.bf16.msra.mxu1 %v1442_v1  ;;  %330 = vmatpush.bf16.msra.mxu2 %v1442_v1  ;;  %v1449_v5 = vld [vmem:[#allocation4 + $0x28] sm:$0xff]  ;;  %v1451_v6 = vld [vmem:[#allocation6 + $0x38] sm:$0xff]  ;;  %v1455_v7 = vld [vmem:[#allocation6 + $0x30] sm:$0xff] }
  0x18   :  { %397 = vmatpush.bf16.msra.mxu3 %v1451_v6  ;;  %v1158_v8 = vld [vmem:[#allocation2 + $0x20] sm:$0xff]  ;;  %v1462_v10 = vld [vmem:[#allocation6 + $0x28] sm:$0xff]  ;;  %v1157_v11 = vld [vmem:[#allocation2 + $0x18] sm:$0xff] }
  0x19   :  { %v1458_v9 = vld [vmem:[#allocation4 + $0x20] sm:$0xff]  ;;  %v1465_v12 = vld [vmem:[#allocation4 + $0x18] sm:$0xff]  ;;  %v1156_v14 = vld [vmem:[#allocation2 + $0x10] sm:$0xff] }
  0x1a   :  { %254 = vmatpush.bf16.msra.mxu0 %v1160_v2  ;;  %v1469_v13 = vld [vmem:[#allocation6 + $0x20] sm:$0xff]  ;;  %v1472_v15 = vld [vmem:[#allocation4 + $0x10] sm:$0xff]  ;;  %v1476_v16 = vld [vmem:[#allocation6 + $0x18] sm:$0xff] }
  0x1b   :  { %315 = vmatpush.bf16.msra.mxu1 %v1445_v3  ;;  %331 = vmatpush.bf16.msra.mxu2 %v1445_v3  ;;  %v1155_v17 = vld [vmem:[#allocation2 + $0x8] sm:$0xff]  ;;  %v1154_v19 = vld [vmem:[#allocation2] sm:$0xff]  ;;  %v1486_v21 = vld [vmem:[#allocation7 + $0x38] sm:$0xff] }
  0x1c   :  { %398 = vmatpush.bf16.msra.mxu3 %v1455_v7  ;;  %v1479_v18 = vld [vmem:[#allocation4 + $0x8] sm:$0xff]  ;;  %v1484_v20 = vld [vmem:[#allocation4] sm:$0xff]  ;;  %v1497_v24 = vld [vmem:[#allocation7 + $0x30] sm:$0xff] }
  0x1d   :  { %v201_v22 = vld [vmem:[%s1834_s0] sm:$0xf]  ;;  %v1502_v25 = vld [vmem:[#allocation7 + $0x28] sm:$0xff]  ;;  %v1512_v26 = vld [vmem:[#allocation6 + $0x10] sm:$0xff] }
  0x1e   :  { %255 = vmatpush.bf16.msra.mxu0 %v1159_v4  ;;  %v182_v23 = vld [vmem:[%s1838_s4] sm:$0x1]  ;;  %v1518_v28 = vld [vmem:[#allocation6 + $0x8] sm:$0xff]  ;;  %v1520_v29 = vld [vmem:[#allocation7 + $0x18] sm:$0xff] }
  0x1f   :  { %316 = vmatpush.bf16.msra.mxu1 %v1449_v5  ;;  %332 = vmatpush.bf16.msra.mxu2 %v1449_v5  ;;  %v1514_v27 = vld [vmem:[#allocation7 + $0x20] sm:$0xff]  ;;  %v1526_v31 = vld [vmem:[#allocation7 + $0x10] sm:$0xff]  ;;  %v1531_v32 = vld [vmem:[#allocation7 + $0x8] sm:$0xff] }
  0x20   :  { %399 = vmatpush.bf16.msra.mxu3 %v1462_v10  ;;  %v1524_v30 = vld [vmem:[#allocation6] sm:$0xff]  ;;  %v1533_v33 = vld [vmem:[#allocation9 + $0x38] sm:$0xff]  ;;  %v1539_v35 = vld [vmem:[#allocation9 + $0x30] sm:$0xff] }
  0x21   :  { %v1536_v34 = vld [vmem:[#allocation7] sm:$0xff]  ;;  %v1548_v37 = vld [vmem:[#allocation9 + $0x28] sm:$0xff]  ;;  %v1558_v39 = vld [vmem:[#allocation9 + $0x18] sm:$0xff] }
  0x22   :  { %256 = vmatpush.bf16.msra.mxu0 %v1158_v8  ;;  %v183_v36 = vld [vmem:[%s1842_s8] sm:$0x1]  ;;  %v1600_v50 = vld [vmem:[#allocation9 + $0x10] sm:$0xff]  ;;  %v1603_v51 = vld [vmem:[#allocation9 + $0x8] sm:$0xff] }
  0x23   :  { %317 = vmatpush.bf16.msra.mxu1 %v1458_v9  ;;  %333 = vmatpush.bf16.msra.mxu2 %v1458_v9  ;;  %v1553_v38 = vld [vmem:[#allocation9 + $0x20] sm:$0xff] }
  0x24   :  { %400 = vmatpush.bf16.msra.mxu3 %v1469_v13  ;;  %v1201_v40 = vld [vmem:[%s1837_s3] ss:$0 sm:$0xff] }
  0x25   :  { %v1606_v52 = vld [vmem:[#allocation9] sm:$0xff] }
  0x26   :  { %257 = vmatpush.bf16.msra.mxu0 %v1157_v11  ;;  %v1617_v54 = vld [vmem:[%s1841_s7] sm:$0x1] }
  0x27   :  { %318 = vmatpush.bf16.msra.mxu1 %v1465_v12  ;;  %334 = vmatpush.bf16.msra.mxu2 %v1465_v12  ;;  %v1659_v11 = vld [vmem:[%s1844_s10] sm:$0x1] }
  0x28   :  { %401 = vmatpush.bf16.msra.mxu3 %v1476_v16 }
  0x2a   :  { %258 = vmatpush.bf16.msra.mxu0 %v1156_v14 }
  0x2b   :  { %319 = vmatpush.bf16.msra.mxu1 %v1472_v15  ;;  %335 = vmatpush.bf16.msra.mxu2 %v1472_v15 }
  0x2c   :  { %402 = vmatpush.bf16.msra.mxu3 %v1512_v26 }
  0x2e   :  { %259 = vmatpush.bf16.msra.mxu0 %v1155_v17 }
  0x2f   :  { %320 = vmatpush.bf16.msra.mxu1 %v1479_v18  ;;  %336 = vmatpush.bf16.msra.mxu2 %v1479_v18 }
  0x30   :  { %403 = vmatpush.bf16.msra.mxu3 %v1518_v28 }
  0x32   :  { %260 = vmatpush.bf16.msra.mxu0 %v1154_v19 }
  0x33   :  { %321 = vmatpush.bf16.msra.mxu1 %v1484_v20  ;;  %337 = vmatpush.bf16.msra.mxu2 %v1484_v20 }
  0x34   :  { %404 = vmatpush.bf16.msra.mxu3 %v1524_v30 }
  0x35   :  { %261 = vmatmul.bf16.vlgmr.msra.gmra.mxu0 %v201_v22 }
  0x36   :  { %459 = vmatpush.bf16.msrb.mxu0 %v1486_v21  ;;  %322 = vmatmul.bf16.vlgmr.msra.gmra.mxu1 %v182_v23 }
  0x37   :  { %541 = vmatpush.bf16.msrb.mxu2 %v1442_v1  ;;  %523 = vmatpush.bf16.msrb.mxu1 %v1533_v33 }
  0x38   :  { %560 = vmatpush.bf16.msrb.mxu3 %v1451_v6 }
  0x3a   :  { %460 = vmatpush.bf16.msrb.mxu0 %v1497_v24 }
  0x3b   :  { %542 = vmatpush.bf16.msrb.mxu2 %v1445_v3  ;;  %524 = vmatpush.bf16.msrb.mxu1 %v1539_v35 }
  0x3c   :  { %561 = vmatpush.bf16.msrb.mxu3 %v1455_v7 }
  0x3e   :  { %461 = vmatpush.bf16.msrb.mxu0 %v1502_v25 }
  0x3f   :  { %543 = vmatpush.bf16.msrb.mxu2 %v1449_v5  ;;  %525 = vmatpush.bf16.msrb.mxu1 %v1548_v37 }
  0x40   :  { %562 = vmatpush.bf16.msrb.mxu3 %v1462_v10 }
  0x42   :  { %462 = vmatpush.bf16.msrb.mxu0 %v1514_v27 }
  0x43   :  { %544 = vmatpush.bf16.msrb.mxu2 %v1458_v9  ;;  %526 = vmatpush.bf16.msrb.mxu1 %v1553_v38 }
  0x44   :  { %563 = vmatpush.bf16.msrb.mxu3 %v1469_v13 }
  0x46   :  { %463 = vmatpush.bf16.msrb.mxu0 %v1520_v29 }
  0x47   :  { %545 = vmatpush.bf16.msrb.mxu2 %v1465_v12  ;;  %527 = vmatpush.bf16.msrb.mxu1 %v1558_v39 }
  0x48   :  { %564 = vmatpush.bf16.msrb.mxu3 %v1476_v16 }
  0x4a   :  { %464 = vmatpush.bf16.msrb.mxu0 %v1526_v31 }
  0x4b   :  { %546 = vmatpush.bf16.msrb.mxu2 %v1472_v15  ;;  %528 = vmatpush.bf16.msrb.mxu1 %v1600_v50 }
  0x4c   :  { %565 = vmatpush.bf16.msrb.mxu3 %v1512_v26 }
  0x4e   :  { %465 = vmatpush.bf16.msrb.mxu0 %v1531_v32 }
  0x4f   :  { %547 = vmatpush.bf16.msrb.mxu2 %v1479_v18  ;;  %529 = vmatpush.bf16.msrb.mxu1 %v1603_v51 }
  0x50   :  { %566 = vmatpush.bf16.msrb.mxu3 %v1518_v28 }
  0x52   :  { %466 = vmatpush.bf16.msrb.mxu0 %v1536_v34 }
  0x53   :  { %548 = vmatpush.bf16.msrb.mxu2 %v1484_v20  ;;  %530 = vmatpush.bf16.msrb.mxu1 %v1606_v52 }
  0x54   :  { %567 = vmatpush.bf16.msrb.mxu3 %v1524_v30 }
  0x55   :  { %467 = vmatmul.bf16.vlgmr.msrb.gmra.mxu0 %v183_v36 }
  0x56   :  { %574 = vmatpush.bf16.msra.mxu0 %v1486_v21 }
  0x57   :  { %590 = vmatpush.bf16.msra.mxu1 %v1533_v33 }
  0x5a   :  { %575 = vmatpush.bf16.msra.mxu0 %v1497_v24 }
  0x5b   :  { %591 = vmatpush.bf16.msra.mxu1 %v1539_v35 }
  0x5e   :  { %576 = vmatpush.bf16.msra.mxu0 %v1502_v25 }
  0x5f   :  { %592 = vmatpush.bf16.msra.mxu1 %v1548_v37 }
  0x62   :  { %577 = vmatpush.bf16.msra.mxu0 %v1514_v27 }
  0x63   :  { %593 = vmatpush.bf16.msra.mxu1 %v1553_v38 }
  0x66   :  { %578 = vmatpush.bf16.msra.mxu0 %v1520_v29 }
  0x67   :  { %594 = vmatpush.bf16.msra.mxu1 %v1558_v39 }
  0x6a   :  { %579 = vmatpush.bf16.msra.mxu0 %v1526_v31 }
  0x6b   :  { %595 = vmatpush.bf16.msra.mxu1 %v1600_v50 }
  0x6e   :  { %580 = vmatpush.bf16.msra.mxu0 %v1531_v32 }
  0x6f   :  { %596 = vmatpush.bf16.msra.mxu1 %v1603_v51 }
  0x72   :  { %581 = vmatpush.bf16.msra.mxu0 %v1536_v34 }
  0x73   :  { %597 = vmatpush.bf16.msra.mxu1 %v1606_v52 }
  0x76   :  { %640 = vmatpush.bf16.msrb.mxu0 %v1486_v21 }
  0x7a   :  { %641 = vmatpush.bf16.msrb.mxu0 %v1497_v24 }
  0x7e   :  { %642 = vmatpush.bf16.msrb.mxu0 %v1502_v25 }
  0x82   :  { %643 = vmatpush.bf16.msrb.mxu0 %v1514_v27 }
  0x86   :  { %644 = vmatpush.bf16.msrb.mxu0 %v1520_v29 }
  0x8a   :  { %645 = vmatpush.bf16.msrb.mxu0 %v1526_v31 }
  0x8e   :  { %646 = vmatpush.bf16.msrb.mxu0 %v1531_v32 }
  0x92   :  { %647 = vmatpush.bf16.msrb.mxu0 %v1536_v34 }
  0xb2   :  { %v262_v41 = vpop.f32.mrf.mxu0 }
  0xb3   :  { %v323_v42 = vpop.f32.mrf.mxu1  ;;  %v1566_v43 = vadd.f32 %v1201_v40, %v262_v41 }
  0xb5   :  { %v327_v44 = vadd.f32 %v323_v42, %v1566_v43 }
  0xb7   :  { %1202 = vtanh.f32 %v327_v44 }
  0xba   :  { %v264_v45 = vpop.f32.mrf.mxu0 }
  0xbb   :  { %v325_v46 = vpop.f32.mrf.mxu1 }
  0xbd   :  { %v1203_v47 = vpop.eup %1202 }
  0xbe   :  { %v329_v48 = vpack.c.bf16 %v1203_v47, %v1203_v47 }
  0xc0   :  { %338 = vmatmul.bf16.vlgmr.msra.gmra.mxu2 %v329_v48  ;;  %405 = vmatmul.bf16.vlgmr.msra.gmra.mxu3 %v329_v48 }
  0xc1   :  { %607 = vmatpush.bf16.msra.mxu2 %v1442_v1  ;;  %626 = vmatpush.bf16.msra.mxu3 %v1451_v6 }
  0xc5   :  { %608 = vmatpush.bf16.msra.mxu2 %v1445_v3  ;;  %627 = vmatpush.bf16.msra.mxu3 %v1455_v7 }
  0xc9   :  { %609 = vmatpush.bf16.msra.mxu2 %v1449_v5  ;;  %628 = vmatpush.bf16.msra.mxu3 %v1462_v10 }
  0xcd   :  { %610 = vmatpush.bf16.msra.mxu2 %v1458_v9  ;;  %629 = vmatpush.bf16.msra.mxu3 %v1469_v13 }
  0xd1   :  { %611 = vmatpush.bf16.msra.mxu2 %v1465_v12  ;;  %630 = vmatpush.bf16.msra.mxu3 %v1476_v16 }
  0xd2   :  { %v468_v49 = vpop.f32.mrf.mxu0 }
  0xd5   :  { %612 = vmatpush.bf16.msra.mxu2 %v1472_v15  ;;  %631 = vmatpush.bf16.msra.mxu3 %v1512_v26 }
  0xd9   :  { %613 = vmatpush.bf16.msra.mxu2 %v1479_v18  ;;  %632 = vmatpush.bf16.msra.mxu3 %v1518_v28 }
  0xda   :  { %v470_v53 = vpop.f32.mrf.mxu0 }
  0xdd   :  { %614 = vmatpush.bf16.msra.mxu2 %v1484_v20  ;;  %633 = vmatpush.bf16.msra.mxu3 %v1524_v30 }
 0x143   :  { %v339_v55 = vpop.f32.mrf.mxu2  ;;  %v406_v56 = vpop.f32.mrf.mxu3 }
 0x144   :  { %v344_v57 = vrot.slane %v339_v55, 7  ;;  %v410_v58 = vadd.f32 %v406_v56, %v1617_v54 }
 0x146   :  { %v346_v59 = vadd.f32 %v344_v57, %v1566_v43  ;;  %v472_v60 = vadd.f32 %v468_v49, %v410_v58 }
 0x148   :  { %1204 = vtanh.f32 %v346_v59 }
 0x149   :  { %1206 = vtanh.f32 %v472_v60 }
 0x14b   :  { %v341_v61 = vpop.f32.mrf.mxu2  ;;  %v408_v62 = vpop.f32.mrf.mxu3 }
 0x14e   :  { %v1205_v63 = vpop.eup %1204 }
 0x14f   :  { %v1207_v0 = vpop.eup %1206  ;;  %v348_v2 = vpack.c.bf16 %v1205_v63, %v1205_v63 }
 0x150   :  { %v474_v4 = vpack.c.bf16 %v1207_v0, %v1207_v0 }
 0x151   :  { %v538_v8 = vshrl.u32 %v348_v2, 16 }
 0x152   :  { %531 = vmatmul.bf16.vlgmr.msrb.gmra.mxu1 %v474_v4  ;;  %582 = vmatmul.bf16.vlgmr.msra.gmra.mxu0 %v474_v4 }
 0x153   :  { %549 = vmatmul.bf16.vlgmr.msrb.gmra.mxu2 %v538_v8  ;;  %568 = vmatmul.bf16.vlgmr.msrb.gmra.mxu3 %v538_v8 }
 0x154   :  { %656 = vmatpush.bf16.msrb.mxu1 %v1533_v33  ;;  %708 = vmatpush.bf16.msra.mxu0 %v1486_v21 }
 0x155   :  { %675 = vmatpush.bf16.msrb.mxu2 %v1442_v1  ;;  %694 = vmatpush.bf16.msrb.mxu3 %v1451_v6 }
 0x158   :  { %657 = vmatpush.bf16.msrb.mxu1 %v1539_v35  ;;  %709 = vmatpush.bf16.msra.mxu0 %v1497_v24 }
 0x159   :  { %676 = vmatpush.bf16.msrb.mxu2 %v1445_v3  ;;  %695 = vmatpush.bf16.msrb.mxu3 %v1455_v7 }
 0x15c   :  { %658 = vmatpush.bf16.msrb.mxu1 %v1548_v37  ;;  %710 = vmatpush.bf16.msra.mxu0 %v1502_v25 }
 0x15d   :  { %677 = vmatpush.bf16.msrb.mxu2 %v1449_v5  ;;  %696 = vmatpush.bf16.msrb.mxu3 %v1462_v10 }
 0x160   :  { %659 = vmatpush.bf16.msrb.mxu1 %v1553_v38  ;;  %711 = vmatpush.bf16.msra.mxu0 %v1514_v27 }
 0x161   :  { %678 = vmatpush.bf16.msrb.mxu2 %v1458_v9  ;;  %697 = vmatpush.bf16.msrb.mxu3 %v1469_v13 }
 0x164   :  { %660 = vmatpush.bf16.msrb.mxu1 %v1558_v39  ;;  %712 = vmatpush.bf16.msra.mxu0 %v1520_v29 }
 0x165   :  { %679 = vmatpush.bf16.msrb.mxu2 %v1465_v12  ;;  %698 = vmatpush.bf16.msrb.mxu3 %v1476_v16 }
 0x168   :  { %661 = vmatpush.bf16.msrb.mxu1 %v1600_v50  ;;  %713 = vmatpush.bf16.msra.mxu0 %v1526_v31 }
 0x169   :  { %680 = vmatpush.bf16.msrb.mxu2 %v1472_v15  ;;  %699 = vmatpush.bf16.msrb.mxu3 %v1512_v26 }
 0x16c   :  { %662 = vmatpush.bf16.msrb.mxu1 %v1603_v51  ;;  %714 = vmatpush.bf16.msra.mxu0 %v1531_v32 }
 0x16d   :  { %681 = vmatpush.bf16.msrb.mxu2 %v1479_v18  ;;  %700 = vmatpush.bf16.msrb.mxu3 %v1518_v28 }
 0x170   :  { %663 = vmatpush.bf16.msrb.mxu1 %v1606_v52  ;;  %715 = vmatpush.bf16.msra.mxu0 %v1536_v34 }
 0x171   :  { %682 = vmatpush.bf16.msrb.mxu2 %v1484_v20  ;;  %701 = vmatpush.bf16.msrb.mxu3 %v1524_v30 }
 0x1cf   :  { %v532_v14 = vpop.f32.mrf.mxu1  ;;  %v583_v17 = vpop.f32.mrf.mxu0 }
 0x1d0   :  { %v533_v19 = vadd.f32 %v532_v14, %v1659_v11 }
 0x1d2   :  { %536 = vst [vmem:[%s1845_s11] sm:$0x1] %v533_v19 }
 0x1d6   :  { %v550_v22 = vpop.f32.mrf.mxu2  ;;  %v569_v23 = vpop.f32.mrf.mxu3 }
 0x1d7   :  { %v534_v36 = vpop.f32.mrf.mxu1  ;;  %v555_v40 = vrot.slane %v550_v22, 6  ;;  %v573_v41 = vadd.f32 %v569_v23, %v1617_v54  ;;  %v585_v42 = vpop.f32.mrf.mxu0 }
 0x1d9   :  { %v557_v44 = vadd.f32 %v555_v40, %v1566_v43  ;;  %v587_v45 = vadd.f32 %v583_v17, %v573_v41 }
 0x1db   :  { %1208 = vtanh.f32 %v557_v44 }
 0x1dc   :  { %1210 = vtanh.f32 %v587_v45 }
 0x1de   :  { %v552_v46 = vpop.f32.mrf.mxu2  ;;  %v571_v47 = vpop.f32.mrf.mxu3 }
 0x1e1   :  { %v1209_v48 = vpop.eup %1208 }
 0x1e2   :  { %v1211_v49 = vpop.eup %1210  ;;  %v559_v53 = vpack.c.bf16 %v1209_v48, %v1209_v48 }
 0x1e3   :  { %v589_v55 = vpack.c.bf16 %v1211_v49, %v1211_v49 }
 0x1e4   :  { %v605_v56 = vrot.slane %v559_v53, 1 }
 0x1e5   :  { %598 = vmatmul.bf16.vlgmr.msra.gmra.mxu1 %v589_v55  ;;  %648 = vmatmul.bf16.vlgmr.msrb.gmra.mxu0 %v589_v55 }
 0x1e6   :  { %615 = vmatmul.bf16.vlgmr.msra.gmra.mxu2 %v605_v56  ;;  %634 = vmatmul.bf16.vlgmr.msra.gmra.mxu3 %v605_v56 }
 0x1e7   :  { %724 = vmatpush.bf16.msra.mxu1 %v1533_v33  ;;  %774 = vmatpush.bf16.msrb.mxu0 %v1486_v21 }
 0x1e8   :  { %741 = vmatpush.bf16.msra.mxu2 %v1442_v1  ;;  %760 = vmatpush.bf16.msra.mxu3 %v1451_v6 }
 0x1eb   :  { %725 = vmatpush.bf16.msra.mxu1 %v1539_v35  ;;  %775 = vmatpush.bf16.msrb.mxu0 %v1497_v24 }
 0x1ec   :  { %742 = vmatpush.bf16.msra.mxu2 %v1445_v3  ;;  %761 = vmatpush.bf16.msra.mxu3 %v1455_v7 }
 0x1ef   :  { %726 = vmatpush.bf16.msra.mxu1 %v1548_v37  ;;  %776 = vmatpush.bf16.msrb.mxu0 %v1502_v25 }
 0x1f0   :  { %743 = vmatpush.bf16.msra.mxu2 %v1449_v5  ;;  %762 = vmatpush.bf16.msra.mxu3 %v1462_v10 }
 0x1f3   :  { %727 = vmatpush.bf16.msra.mxu1 %v1553_v38  ;;  %777 = vmatpush.bf16.msrb.mxu0 %v1514_v27 }
 0x1f4   :  { %744 = vmatpush.bf16.msra.mxu2 %v1458_v9  ;;  %763 = vmatpush.bf16.msra.mxu3 %v1469_v13 }
 0x1f7   :  { %728 = vmatpush.bf16.msra.mxu1 %v1558_v39  ;;  %778 = vmatpush.bf16.msrb.mxu0 %v1520_v29 }
 0x1f8   :  { %745 = vmatpush.bf16.msra.mxu2 %v1465_v12  ;;  %764 = vmatpush.bf16.msra.mxu3 %v1476_v16 }
 0x1fb   :  { %729 = vmatpush.bf16.msra.mxu1 %v1600_v50  ;;  %779 = vmatpush.bf16.msrb.mxu0 %v1526_v31 }
 0x1fc   :  { %746 = vmatpush.bf16.msra.mxu2 %v1472_v15  ;;  %765 = vmatpush.bf16.msra.mxu3 %v1512_v26 }
 0x1ff   :  { %730 = vmatpush.bf16.msra.mxu1 %v1603_v51  ;;  %780 = vmatpush.bf16.msrb.mxu0 %v1531_v32 }
 0x200   :  { %747 = vmatpush.bf16.msra.mxu2 %v1479_v18  ;;  %766 = vmatpush.bf16.msra.mxu3 %v1518_v28 }
 0x203   :  { %731 = vmatpush.bf16.msra.mxu1 %v1606_v52  ;;  %781 = vmatpush.bf16.msrb.mxu0 %v1536_v34 }
 0x204   :  { %748 = vmatpush.bf16.msra.mxu2 %v1484_v20  ;;  %767 = vmatpush.bf16.msra.mxu3 %v1524_v30 }
 0x262   :  { %v599_v57 = vpop.f32.mrf.mxu1  ;;  %v649_v58 = vpop.f32.mrf.mxu0 }
 0x263   :  { %v600_v59 = vadd.f32 %v599_v57, %v1659_v11 }
 0x265   :  { %603 = vst [vmem:[%s1845_s11 + $0x1] sm:$0x1] %v600_v59 }
 0x269   :  { %v616_v60 = vpop.f32.mrf.mxu2  ;;  %v635_v61 = vpop.f32.mrf.mxu3 }
 0x26a   :  { %v601_v62 = vpop.f32.mrf.mxu1  ;;  %v621_v63 = vrot.slane %v616_v60, 5  ;;  %v639_v0 = vadd.f32 %v635_v61, %v1617_v54  ;;  %v651_v2 = vpop.f32.mrf.mxu0 }
 0x26c   :  { %v623_v4 = vadd.f32 %v621_v63, %v1566_v43  ;;  %v653_v8 = vadd.f32 %v649_v58, %v639_v0 }
 0x26e   :  { %1212 = vtanh.f32 %v623_v4 }
 0x26f   :  { %1214 = vtanh.f32 %v653_v8 }
 0x271   :  { %v618_v14 = vpop.f32.mrf.mxu2  ;;  %v637_v17 = vpop.f32.mrf.mxu3 }
 0x274   :  { %v1213_v19 = vpop.eup %1212 }
 0x275   :  { %v1215_v22 = vpop.eup %1214  ;;  %v625_v23 = vpack.c.bf16 %v1213_v19, %v1213_v19 }
 0x276   :  { %v655_v36 = vpack.c.bf16 %v1215_v22, %v1215_v22 }
 0x277   :  { %v671_v40 = vshrl.u32 %v625_v23, 16 }
 0x278   :  { %664 = vmatmul.bf16.vlgmr.msrb.gmra.mxu1 %v655_v36  ;;  %716 = vmatmul.bf16.vlgmr.msra.gmra.mxu0 %v655_v36 }
 0x279   :  { %v673_v41 = vrot.slane %v671_v40, 1  ;;  %790 = vmatpush.bf16.msrb.mxu1 %v1533_v33  ;;  %842 = vmatpush.bf16.msra.mxu0 %v1486_v21 }
 0x27b   :  { %683 = vmatmul.bf16.vlgmr.msrb.gmra.mxu2 %v673_v41  ;;  %702 = vmatmul.bf16.vlgmr.msrb.gmra.mxu3 %v673_v41 }
 0x27c   :  { %809 = vmatpush.bf16.msrb.mxu2 %v1442_v1  ;;  %828 = vmatpush.bf16.msrb.mxu3 %v1451_v6 }
 0x27d   :  { %791 = vmatpush.bf16.msrb.mxu1 %v1539_v35  ;;  %843 = vmatpush.bf16.msra.mxu0 %v1497_v24 }
 0x280   :  { %810 = vmatpush.bf16.msrb.mxu2 %v1445_v3  ;;  %829 = vmatpush.bf16.msrb.mxu3 %v1455_v7 }
 0x281   :  { %792 = vmatpush.bf16.msrb.mxu1 %v1548_v37  ;;  %844 = vmatpush.bf16.msra.mxu0 %v1502_v25 }
 0x284   :  { %811 = vmatpush.bf16.msrb.mxu2 %v1449_v5  ;;  %830 = vmatpush.bf16.msrb.mxu3 %v1462_v10 }
 0x285   :  { %793 = vmatpush.bf16.msrb.mxu1 %v1553_v38  ;;  %845 = vmatpush.bf16.msra.mxu0 %v1514_v27 }
 0x288   :  { %812 = vmatpush.bf16.msrb.mxu2 %v1458_v9  ;;  %831 = vmatpush.bf16.msrb.mxu3 %v1469_v13 }
 0x289   :  { %794 = vmatpush.bf16.msrb.mxu1 %v1558_v39  ;;  %846 = vmatpush.bf16.msra.mxu0 %v1520_v29 }
 0x28c   :  { %813 = vmatpush.bf16.msrb.mxu2 %v1465_v12  ;;  %832 = vmatpush.bf16.msrb.mxu3 %v1476_v16 }
 0x28d   :  { %795 = vmatpush.bf16.msrb.mxu1 %v1600_v50  ;;  %847 = vmatpush.bf16.msra.mxu0 %v1526_v31 }
 0x290   :  { %814 = vmatpush.bf16.msrb.mxu2 %v1472_v15  ;;  %833 = vmatpush.bf16.msrb.mxu3 %v1512_v26 }
 0x291   :  { %796 = vmatpush.bf16.msrb.mxu1 %v1603_v51  ;;  %848 = vmatpush.bf16.msra.mxu0 %v1531_v32 }
 0x294   :  { %815 = vmatpush.bf16.msrb.mxu2 %v1479_v18  ;;  %834 = vmatpush.bf16.msrb.mxu3 %v1518_v28 }
 0x295   :  { %797 = vmatpush.bf16.msrb.mxu1 %v1606_v52  ;;  %849 = vmatpush.bf16.msra.mxu0 %v1536_v34 }
 0x298   :  { %816 = vmatpush.bf16.msrb.mxu2 %v1484_v20  ;;  %835 = vmatpush.bf16.msrb.mxu3 %v1524_v30 }
 0x2f5   :  { %v665_v42 = vpop.f32.mrf.mxu1  ;;  %v717_v44 = vpop.f32.mrf.mxu0 }
 0x2f6   :  { %v666_v45 = vadd.f32 %v665_v42, %v1659_v11 }
 0x2f8   :  { %669 = vst [vmem:[%s1845_s11 + $0x2] sm:$0x1] %v666_v45 }
 0x2fd   :  { %v667_v46 = vpop.f32.mrf.mxu1  ;;  %v719_v47 = vpop.f32.mrf.mxu0 }
 0x2fe   :  { %v684_v48 = vpop.f32.mrf.mxu2  ;;  %v703_v49 = vpop.f32.mrf.mxu3 }
 0x2ff   :  { %v689_v53 = vrot.slane %v684_v48, 4  ;;  %v707_v55 = vadd.f32 %v703_v49, %v1617_v54 }
 0x301   :  { %v691_v56 = vadd.f32 %v689_v53, %v1566_v43  ;;  %v721_v57 = vadd.f32 %v717_v44, %v707_v55 }
 0x303   :  { %1216 = vtanh.f32 %v691_v56 }
 0x304   :  { %1218 = vtanh.f32 %v721_v57 }
 0x306   :  { %v686_v58 = vpop.f32.mrf.mxu2  ;;  %v705_v59 = vpop.f32.mrf.mxu3 }
 0x309   :  { %v1217_v60 = vpop.eup %1216 }
 0x30a   :  { %v1219_v61 = vpop.eup %1218  ;;  %v693_v62 = vpack.c.bf16 %v1217_v60, %v1217_v60 }
 0x30b   :  { %v723_v63 = vpack.c.bf16 %v1219_v61, %v1219_v61 }
 0x30c   :  { %v739_v0 = vrot.slane %v693_v62, 2 }
 0x30d   :  { %732 = vmatmul.bf16.vlgmr.msra.gmra.mxu1 %v723_v63  ;;  %782 = vmatmul.bf16.vlgmr.msrb.gmra.mxu0 %v723_v63 }
 0x30e   :  { %749 = vmatmul.bf16.vlgmr.msra.gmra.mxu2 %v739_v0  ;;  %768 = vmatmul.bf16.vlgmr.msra.gmra.mxu3 %v739_v0 }
 0x30f   :  { %858 = vmatpush.bf16.msra.mxu1 %v1533_v33  ;;  %908 = vmatpush.bf16.msrb.mxu0 %v1486_v21 }
 0x310   :  { %875 = vmatpush.bf16.msra.mxu2 %v1442_v1  ;;  %894 = vmatpush.bf16.msra.mxu3 %v1451_v6 }
 0x313   :  { %859 = vmatpush.bf16.msra.mxu1 %v1539_v35  ;;  %909 = vmatpush.bf16.msrb.mxu0 %v1497_v24 }
 0x314   :  { %876 = vmatpush.bf16.msra.mxu2 %v1445_v3  ;;  %895 = vmatpush.bf16.msra.mxu3 %v1455_v7 }
 0x317   :  { %860 = vmatpush.bf16.msra.mxu1 %v1548_v37  ;;  %910 = vmatpush.bf16.msrb.mxu0 %v1502_v25 }
 0x318   :  { %877 = vmatpush.bf16.msra.mxu2 %v1449_v5  ;;  %896 = vmatpush.bf16.msra.mxu3 %v1462_v10 }
 0x31b   :  { %861 = vmatpush.bf16.msra.mxu1 %v1553_v38  ;;  %911 = vmatpush.bf16.msrb.mxu0 %v1514_v27 }
 0x31c   :  { %878 = vmatpush.bf16.msra.mxu2 %v1458_v9  ;;  %897 = vmatpush.bf16.msra.mxu3 %v1469_v13 }
 0x31f   :  { %862 = vmatpush.bf16.msra.mxu1 %v1558_v39  ;;  %912 = vmatpush.bf16.msrb.mxu0 %v1520_v29 }
 0x320   :  { %879 = vmatpush.bf16.msra.mxu2 %v1465_v12  ;;  %898 = vmatpush.bf16.msra.mxu3 %v1476_v16 }
 0x323   :  { %863 = vmatpush.bf16.msra.mxu1 %v1600_v50  ;;  %913 = vmatpush.bf16.msrb.mxu0 %v1526_v31 }
 0x324   :  { %880 = vmatpush.bf16.msra.mxu2 %v1472_v15  ;;  %899 = vmatpush.bf16.msra.mxu3 %v1512_v26 }
 0x327   :  { %864 = vmatpush.bf16.msra.mxu1 %v1603_v51  ;;  %914 = vmatpush.bf16.msrb.mxu0 %v1531_v32 }
 0x328   :  { %881 = vmatpush.bf16.msra.mxu2 %v1479_v18  ;;  %900 = vmatpush.bf16.msra.mxu3 %v1518_v28 }
 0x32b   :  { %865 = vmatpush.bf16.msra.mxu1 %v1606_v52  ;;  %915 = vmatpush.bf16.msrb.mxu0 %v1536_v34 }
 0x32c   :  { %882 = vmatpush.bf16.msra.mxu2 %v1484_v20  ;;  %901 = vmatpush.bf16.msra.mxu3 %v1524_v30 }
 0x38a   :  { %v733_v1 = vpop.f32.mrf.mxu1  ;;  %v783_v3 = vpop.f32.mrf.mxu0 }
 0x38b   :  { %v734_v5 = vadd.f32 %v733_v1, %v1659_v11 }
 0x38d   :  { %737 = vst [vmem:[%s1845_s11 + $0x3] sm:$0x1] %v734_v5 }
 0x391   :  { %v750_v9 = vpop.f32.mrf.mxu2  ;;  %v769_v12 = vpop.f32.mrf.mxu3 }
 0x392   :  { %v735_v15 = vpop.f32.mrf.mxu1  ;;  %v755_v18 = vrot.slane %v750_v9, 3  ;;  %v773_v2 = vadd.f32 %v769_v12, %v1617_v54  ;;  %v785_v4 = vpop.f32.mrf.mxu0 }
 0x394   :  { %v757_v8 = vadd.f32 %v755_v18, %v1566_v43  ;;  %v787_v20 = vadd.f32 %v783_v3, %v773_v2 }
 0x396   :  { %1220 = vtanh.f32 %v757_v8 }
 0x397   :  { %1222 = vtanh.f32 %v787_v20 }
 0x399   :  { %v752_v14 = vpop.f32.mrf.mxu2  ;;  %v771_v17 = vpop.f32.mrf.mxu3 }
 0x39c   :  { %v1221_v19 = vpop.eup %1220 }
 0x39d   :  { %v1223_v22 = vpop.eup %1222  ;;  %v759_v23 = vpack.c.bf16 %v1221_v19, %v1221_v19 }
 0x39e   :  { %v789_v36 = vpack.c.bf16 %v1223_v22, %v1223_v22 }
 0x39f   :  { %v805_v40 = vshrl.u32 %v759_v23, 16 }
 0x3a0   :  { %798 = vmatmul.bf16.vlgmr.msrb.gmra.mxu1 %v789_v36  ;;  %850 = vmatmul.bf16.vlgmr.msra.gmra.mxu0 %v789_v36 }
 0x3a1   :  { %v807_v41 = vrot.slane %v805_v40, 2  ;;  %924 = vmatpush.bf16.msrb.mxu1 %v1533_v33  ;;  %973 = vmatpush.bf16.msra.mxu0 %v1533_v33 }
 0x3a3   :  { %817 = vmatmul.bf16.vlgmr.msrb.gmra.mxu2 %v807_v41  ;;  %836 = vmatmul.bf16.vlgmr.msrb.gmra.mxu3 %v807_v41 }
 0x3a4   :  { %957 = vmatpush.bf16.msrb.mxu3 %v1486_v21  ;;  %943 = vmatpush.bf16.msrb.mxu2 %v1451_v6 }
 0x3a5   :  { %925 = vmatpush.bf16.msrb.mxu1 %v1539_v35  ;;  %974 = vmatpush.bf16.msra.mxu0 %v1539_v35 }
 0x3a8   :  { %958 = vmatpush.bf16.msrb.mxu3 %v1497_v24  ;;  %944 = vmatpush.bf16.msrb.mxu2 %v1455_v7 }
 0x3a9   :  { %926 = vmatpush.bf16.msrb.mxu1 %v1548_v37  ;;  %975 = vmatpush.bf16.msra.mxu0 %v1548_v37 }
 0x3ac   :  { %959 = vmatpush.bf16.msrb.mxu3 %v1502_v25  ;;  %945 = vmatpush.bf16.msrb.mxu2 %v1462_v10 }
 0x3ad   :  { %927 = vmatpush.bf16.msrb.mxu1 %v1553_v38  ;;  %976 = vmatpush.bf16.msra.mxu0 %v1553_v38 }
 0x3b0   :  { %960 = vmatpush.bf16.msrb.mxu3 %v1514_v27  ;;  %946 = vmatpush.bf16.msrb.mxu2 %v1469_v13 }
 0x3b1   :  { %928 = vmatpush.bf16.msrb.mxu1 %v1558_v39  ;;  %977 = vmatpush.bf16.msra.mxu0 %v1558_v39 }
 0x3b4   :  { %961 = vmatpush.bf16.msrb.mxu3 %v1520_v29  ;;  %947 = vmatpush.bf16.msrb.mxu2 %v1476_v16 }
 0x3b5   :  { %929 = vmatpush.bf16.msrb.mxu1 %v1600_v50  ;;  %978 = vmatpush.bf16.msra.mxu0 %v1600_v50 }
 0x3b8   :  { %962 = vmatpush.bf16.msrb.mxu3 %v1526_v31  ;;  %948 = vmatpush.bf16.msrb.mxu2 %v1512_v26 }
 0x3b9   :  { %930 = vmatpush.bf16.msrb.mxu1 %v1603_v51  ;;  %979 = vmatpush.bf16.msra.mxu0 %v1603_v51 }
 0x3bc   :  { %963 = vmatpush.bf16.msrb.mxu3 %v1531_v32  ;;  %949 = vmatpush.bf16.msrb.mxu2 %v1518_v28 }
 0x3bd   :  { %931 = vmatpush.bf16.msrb.mxu1 %v1606_v52  ;;  %980 = vmatpush.bf16.msra.mxu0 %v1606_v52 }
 0x3c0   :  { %964 = vmatpush.bf16.msrb.mxu3 %v1536_v34  ;;  %950 = vmatpush.bf16.msrb.mxu2 %v1524_v30 }
 0x41d   :  { %v799_v6 = vpop.f32.mrf.mxu1  ;;  %v851_v7 = vpop.f32.mrf.mxu0 }
 0x41e   :  { %v800_v10 = vadd.f32 %v799_v6, %v1659_v11 }
 0x420   :  { %803 = vst [vmem:[%s1845_s11 + $0x4] sm:$0x1] %v800_v10 }
 0x425   :  { %v801_v13 = vpop.f32.mrf.mxu1  ;;  %v853_v16 = vpop.f32.mrf.mxu0 }
 0x426   :  { %v818_v21 = vpop.f32.mrf.mxu2  ;;  %v837_v24 = vpop.f32.mrf.mxu3 }
 0x427   :  { %v823_v25 = vrot.slane %v818_v21, 2  ;;  %v841_v26 = vadd.f32 %v837_v24, %v1617_v54 }
 0x429   :  { %v825_v27 = vadd.f32 %v823_v25, %v1566_v43  ;;  %v855_v28 = vadd.f32 %v851_v7, %v841_v26 }
 0x42b   :  { %1224 = vtanh.f32 %v825_v27 }
 0x42c   :  { %1226 = vtanh.f32 %v855_v28 }
 0x42e   :  { %v820_v29 = vpop.f32.mrf.mxu2  ;;  %v839_v30 = vpop.f32.mrf.mxu3 }
 0x431   :  { %v1225_v31 = vpop.eup %1224 }
 0x432   :  { %v1227_v32 = vpop.eup %1226  ;;  %v827_v33 = vpack.c.bf16 %v1225_v31, %v1225_v31 }
 0x433   :  { %v857_v34 = vpack.c.bf16 %v1227_v32, %v1227_v32 }
 0x434   :  { %v873_v35 = vrot.slane %v827_v33, 3 }
 0x435   :  { %866 = vmatmul.bf16.vlgmr.msra.gmra.mxu1 %v857_v34  ;;  %916 = vmatmul.bf16.vlgmr.msrb.gmra.mxu0 %v857_v34 }
 0x436   :  { %883 = vmatmul.bf16.vlgmr.msra.gmra.mxu2 %v873_v35  ;;  %902 = vmatmul.bf16.vlgmr.msra.gmra.mxu3 %v873_v35 }
 0x4b2   :  { %v867_v37 = vpop.f32.mrf.mxu1  ;;  %v917_v38 = vpop.f32.mrf.mxu0 }
 0x4b3   :  { %v868_v39 = vadd.f32 %v867_v37, %v1659_v11 }
 0x4b5   :  { %871 = vst [vmem:[%s1845_s11 + $0x5] sm:$0x1] %v868_v39 }
 0x4b9   :  { %v884_v50 = vpop.f32.mrf.mxu2  ;;  %v903_v51 = vpop.f32.mrf.mxu3 }
 0x4ba   :  { %v869_v52 = vpop.f32.mrf.mxu1  ;;  %v889_v42 = vrot.slane %v884_v50, 1  ;;  %v907_v44 = vadd.f32 %v903_v51, %v1617_v54  ;;  %v919_v45 = vpop.f32.mrf.mxu0 }
 0x4bc   :  { %v891_v46 = vadd.f32 %v889_v42, %v1566_v43  ;;  %v921_v47 = vadd.f32 %v917_v38, %v907_v44 }
 0x4be   :  { %1228 = vtanh.f32 %v891_v46 }
 0x4bf   :  { %1230 = vtanh.f32 %v921_v47 }
 0x4c1   :  { %v886_v48 = vpop.f32.mrf.mxu2  ;;  %v905_v49 = vpop.f32.mrf.mxu3 }
 0x4c4   :  { %v1229_v53 = vpop.eup %1228 }
 0x4c5   :  { %v1231_v55 = vpop.eup %1230  ;;  %v893_v56 = vpack.c.bf16 %v1229_v53, %v1229_v53 }
 0x4c6   :  { %v923_v57 = vpack.c.bf16 %v1231_v55, %v1231_v55 }
 0x4c7   :  { %v939_v58 = vshrl.u32 %v893_v56, 16 }
 0x4c8   :  { %932 = vmatmul.bf16.vlgmr.msrb.gmra.mxu1 %v923_v57  ;;  %965 = vmatmul.bf16.vlgmr.msrb.gmra.mxu3 %v923_v57 }
 0x4c9   :  { %v941_v59 = vrot.slane %v939_v58, 3 }
 0x4cb   :  { %951 = vmatmul.bf16.vlgmr.msrb.gmra.mxu2 %v941_v59 }
 0x545   :  { %v933_v60 = vpop.f32.mrf.mxu1 }
 0x546   :  { %v934_v61 = vadd.f32 %v933_v60, %v1659_v11 }
 0x548   :  { %937 = vst [vmem:[%s1845_s11 + $0x6] sm:$0x1] %v934_v61 }
 0x54b   :  { %v966_v43 = vpop.f32.mrf.mxu3 }
 0x54d   :  { %v935_v62 = vpop.f32.mrf.mxu1 }
 0x54e   :  { %v952_v63 = vpop.f32.mrf.mxu2 }
 0x54f   :  { %v956_v0 = vadd.f32 %v952_v63, %v1617_v54 }
 0x551   :  { %v970_v1 = vadd.f32 %v966_v43, %v956_v0 }
 0x553   :  { %1232 = vtanh.f32 %v970_v1  ;;  %v968_v3 = vpop.f32.mrf.mxu3 }
 0x556   :  { %v954_v5 = vpop.f32.mrf.mxu2 }
 0x559   :  { %v1233_v9 = vpop.eup %1232 }
 0x55a   :  { %v972_v12 = vpack.c.bf16 %v1233_v9, %v1233_v9 }
 0x55c   :  { %981 = vmatmul.bf16.vlgmr.msra.gmra.mxu0 %v972_v12 }
 0x5d9   :  { %v982_v15 = vpop.f32.mrf.mxu0 }
 0x5da   :  { %v983_v18 = vadd.f32 %v982_v15, %v1659_v11 }
 0x5dc   :  { %986 = vst [vmem:[%s1845_s11 + $0x7] sm:$0x1] %v983_v18 }
 0x5e1   :  { %v984_v2 = vpop.f32.mrf.mxu0 }
 0x5e2   :  { %991 = vsyncpa [#allocation3], 1 }
 0x5e3   :  { %992 = vsyncpa [#allocation5], 1 }
 0x5e4   :  { %993 = vsyncpa [#allocation8], 1 }

</bundles_post_ra>
